<compile_context>
chip_gen: v7x
topology: tpu7x:2x2x1
jax: 0.10.0
libtpu: 0.0.40
codegen_flags: <defaults>
</compile_context>

<pallas_src>
import functools

import numpy as np
import jax
import jax.numpy as jnp
from jax import lax
from jax.experimental import pallas as pl
from jax.experimental.pallas import tpu as pltpu


# ----------------------------------------------------------------------------
# Pallas kernel: one grid step = one LSTM direction over one time chunk.
# grid = (ndirs, num_chunks); chunk axis is "arbitrary" (sequential recurrence).
# Refs (dir axis squeezed by the BlockSpecs):
#   gx_ref  : (Tc, Bp, 4H)  bf16   precomputed x @ W_ih^T + (b_ih + b_hh) chunk
#   whh_ref : (H, 4H)       bf16   W_hh^T for this direction
# Outputs:
#   out_ref : (Tc, Bp, H)   f32    per-step hidden states (forward time order)
#   hT_ref  : (Bp, H)       f32    final hidden state of this direction
#   cT_ref  : (Bp, H)       f32    final cell state of this direction
# Scratch (persist across grid steps -> carry h/c across chunks):
#   h_scr, c_scr : (Bp, H)  f32
# ----------------------------------------------------------------------------
def lstm_dir_kernel(gx_ref, whh_ref, out_ref, hT_ref, cT_ref, h_scr, c_scr,
                    *, t_real, t_pad):
    tc, _, _ = gx_ref.shape
    h = h_scr.shape[-1]

    d = pl.program_id(0)          # direction: 0 = forward, 1 = backward
    c = pl.program_id(1)          # chunk position in the grid's scan order
    nc = pl.num_programs(1)
    rev = d == 1

    # Fresh zero state at the first chunk of each direction.
    @pl.when(c == 0)
    def _init():
        h_scr[...] = jnp.zeros_like(h_scr)
        c_scr[...] = jnp.zeros_like(c_scr)

    # Hoist the recurrent weight load out of the timestep loop.
    whh = whh_ref[...]                                   # (H, 4H) bf16

    # Read chunk-carry state once; carry in registers inside the chunk.
    h0 = h_scr[...]
    c0 = c_scr[...]

    needs_mask = t_pad != t_real                          # static (Python bool)
    if needs_mask:
        # Global chunk actually being processed (backward reads reversed chunks).
        cc = jnp.where(rev, nc - 1 - c, c)
        t_base = cc * tc

    def step(s, carry):
        h_prev, c_prev = carry
        # Scan order inside the chunk: forward 0..Tc-1, backward Tc-1..0.
        l = jnp.where(rev, tc - 1 - s, s)
        # Only the serial recurrent dot remains on the critical path.
        gates = gx_ref[l].astype(jnp.float32) + jnp.dot(
            h_prev.astype(jnp.bfloat16), whh,
            preferred_element_type=jnp.float32)           # (Bp, 4H) f32
        # PyTorch LSTM gate order: i, f, g, o
        i = jax.nn.sigmoid(gates[:, 0:h])
        f = jax.nn.sigmoid(gates[:, h:2 * h])
        g = jnp.tanh(gates[:, 2 * h:3 * h])
        o = jax.nn.sigmoid(gates[:, 3 * h:4 * h])
        c_new = f * c_prev + i * g
        h_new = o * jnp.tanh(c_new)
        if needs_mask:
            # Freeze state on padded timesteps (time was padded to a multiple
            # of the chunk size).  Padded steps are trailing for fwd and
            # leading (zero state) for bwd, so freezing is exact.
            valid = (t_base + l) < t_real
            h_new = jnp.where(valid, h_new, h_prev)
            c_new = jnp.where(valid, c_new, c_prev)
        # Writing at local index l puts the backward-direction outputs
        # directly in forward time order (no post-hoc flip).
        out_ref[l] = h_new
        return (h_new, c_new)

    unroll = tc if tc <= 8 else 4
    h_fin, c_fin = lax.fori_loop(0, tc, step, (h0, c0), unroll=unroll)

    # One VMEM round trip per chunk (not per step).
    h_scr[...] = h_fin
    c_scr[...] = c_fin
    # hT/cT blocks stay resident across the chunk axis; last write wins.
    hT_ref[...] = h_fin
    cT_ref[...] = c_fin


def lstm_bidi_layer(gates_x, whh_t, *, t_real, time_chunk):
    """Run all directions of one LSTM layer in a single fused pallas_call.

    gates_x : (ndirs, T_pad, B_pad, 4H) bf16  precomputed x @ W_ih^T + bias
    whh_t   : (ndirs, H, 4H)            bf16  W_hh^T per direction
    Returns out (ndirs, T_pad, B_pad, H) f32 (forward time order for BOTH dirs),
            h_T (ndirs, B_pad, H) f32, c_T (ndirs, B_pad, H) f32.
    """
    ndirs, t_pad, b_pad, h4 = gates_x.shape
    h = h4 // 4
    assert t_pad % time_chunk == 0
    nc = t_pad // time_chunk

    def chunk_idx(d, c):
        # forward (d==0): c ; backward (d==1): nc-1-c  (pure int arithmetic)
        return d * (nc - 1 - 2 * c) + c

    gx_spec = pl.BlockSpec((None, time_chunk, b_pad, h4),
                           lambda d, c: (d, chunk_idx(d, c), 0, 0))
    whh_spec = pl.BlockSpec((None, h, h4), lambda d, c: (d, 0, 0))
    out_spec = pl.BlockSpec((None, time_chunk, b_pad, h),
                            lambda d, c: (d, chunk_idx(d, c), 0, 0))
    hT_spec = pl.BlockSpec((None, b_pad, h), lambda d, c: (d, 0, 0))
    cT_spec = pl.BlockSpec((None, b_pad, h), lambda d, c: (d, 0, 0))

    # VMEM budget: double-buffered gx/out chunks + whh + state/hT/cT, with
    # margin for compiler scratch; capped well below v7x's 64 MiB.
    bytes_gx = time_chunk * b_pad * h4 * 2          # bf16 chunk
    bytes_out = time_chunk * b_pad * h * 4          # f32 chunk
    bytes_whh = h * h4 * 2
    bytes_state = 4 * b_pad * h * 4                 # scratch h/c + hT/cT blocks
    need = 2 * (bytes_gx + bytes_out + bytes_whh) + bytes_state
    vmem_limit = int(min(max(2 * need, 32 << 20), 48 << 20))

    kernel = functools.partial(lstm_dir_kernel, t_real=t_real, t_pad=t_pad)

    return pl.pallas_call(
        kernel,
        out_shape=(
            jax.ShapeDtypeStruct((ndirs, t_pad, b_pad, h), jnp.float32),
            jax.ShapeDtypeStruct((ndirs, b_pad, h), jnp.float32),
            jax.ShapeDtypeStruct((ndirs, b_pad, h), jnp.float32),
        ),
        grid_spec=pltpu.PrefetchScalarGridSpec(
            num_scalar_prefetch=0,
            grid=(ndirs, nc),
            in_specs=[gx_spec, whh_spec],
            out_specs=(out_spec, hT_spec, cT_spec),
            scratch_shapes=[
                pltpu.VMEM((b_pad, h), jnp.float32),
                pltpu.VMEM((b_pad, h), jnp.float32),
            ],
        ),
        compiler_params=pltpu.CompilerParams(
            # dirs independent; chunk axis carries the recurrence.
            dimension_semantics=("parallel", "arbitrary"),
            vmem_limit_bytes=vmem_limit,
        ),
    )(gates_x, whh_t)


# ----------------------------------------------------------------------------
# Encoder: num_layers stacked bidirectional LSTM layers + repackage_bidi.
# ----------------------------------------------------------------------------
def init_encoder_params(key, in_dim, hid_dim, num_layers, bidi=True):
    num_dirs = 2 if bidi else 1
    H = hid_dim // num_dirs
    stdv = 1.0 / np.sqrt(H)
    params = []
    for layer in range(num_layers):
        layer_in = in_dim if layer == 0 else H * num_dirs
        dirs = []
        for _ in range(num_dirs):
            key, k1, k2, k3, k4 = jax.random.split(key, 5)
            w_ih = jax.random.uniform(k1, (4 * H, layer_in), jnp.float32, -stdv, stdv)
            w_hh = jax.random.uniform(k2, (4 * H, H), jnp.float32, -stdv, stdv)
            b_ih = jax.random.uniform(k3, (4 * H,), jnp.float32, -stdv, stdv)
            b_hh = jax.random.uniform(k4, (4 * H,), jnp.float32, -stdv, stdv)
            dirs.append((w_ih, w_hh, b_ih, b_hh))
        params.append(dirs)
    return params


def _prep_dir_weights(dirs, prev_ndirs, prev_feat):
    """Cast/reshape per-direction weights for one layer.

    Returns wihT (ndirs, prev_ndirs, prev_feat, 4H) bf16,
            whhT (ndirs, H, 4H) bf16, bias (ndirs, 4H) f32 (b_ih + b_hh).
    """
    ndirs = len(dirs)
    wihT = jnp.stack([jnp.asarray(p[0], jnp.float32).T for p in dirs])  # (n, in, 4H)
    h4 = wihT.shape[-1]
    assert wihT.shape[1] == prev_ndirs * prev_feat
    wihT = wihT.reshape(ndirs, prev_ndirs, prev_feat, h4).astype(jnp.bfloat16)
    whhT = jnp.stack([jnp.asarray(p[1], jnp.float32).T for p in dirs]).astype(jnp.bfloat16)
    bias = jnp.stack([jnp.asarray(p[2] + p[3], jnp.float32) for p in dirs])
    return wihT, whhT, bias


def encoder_forward(inp, params, bidi=True, time_chunk=32):
    """Matches seqmod Encoder.forward (LSTM, zero initial hidden state).

    inp: (seq_len, batch, in_dim)
    Returns: outs (T, B, hid_dim), (h_t, c_t) each (num_layers, B, hid_dim)
    """
    x = jnp.asarray(inp, jnp.float32)
    T, B, D = x.shape
    tc = min(time_chunk, T)
    t_pad = -(-T // tc) * tc                     # pad time to a chunk multiple
    b_pad = -(-B // 8) * 8                       # pad batch to sublane multiple

    # Activations kept in "stacked-direction" form (P, T_pad, B_pad, F);
    # P=1 for the raw input, P=ndirs after each layer. The next layer's input
    # projection consumes this directly (no per-layer concat round trip).
    acts = jnp.pad(x, ((0, t_pad - T), (0, b_pad - B), (0, 0)))[None]
    prev_ndirs, prev_feat = 1, D

    h_layers, c_layers = [], []
    for dirs in params:
        ndirs = len(dirs)
        wihT, whhT, bias = _prep_dir_weights(dirs, prev_ndirs, prev_feat)
        H = whhT.shape[1]

        # Hoisted input projection for all directions: one big MXU-shaped
        # bf16 einsum outside the recurrence; bias folded in; stored in bf16.
        gates_x = jnp.einsum('ptbf,npfo->ntbo',
                             acts.astype(jnp.bfloat16), wihT,
                             preferred_element_type=jnp.float32)
        gates_x = (gates_x + bias[:, None, None, :]).astype(jnp.bfloat16)

        out, h_t, c_t = lstm_bidi_layer(gates_x, whhT, t_real=T, time_chunk=tc)

        acts = out
        prev_ndirs, prev_feat = ndirs, H

        # repackage_bidi: concat fwd/bwd final states along the feature dim.
        if ndirs == 2:
            h_layers.append(jnp.concatenate([h_t[0, :B], h_t[1, :B]], axis=-1))
            c_layers.append(jnp.concatenate([c_t[0, :B], c_t[1, :B]], axis=-1))
        else:
            h_layers.append(h_t[0, :B])
            c_layers.append(c_t[0, :B])

    # Only the final returned output needs the (T, B, ndirs*H) layout.
    if acts.shape[0] == 2:
        outs = jnp.concatenate([acts[0, :T, :B], acts[1, :T, :B]], axis=-1)
    else:
        outs = acts[0, :T, :B]
    return outs, (jnp.stack(h_layers, axis=0), jnp.stack(c_layers, axis=0))


# ----------------------------------------------------------------------------
# Pure-JAX reference (lax.scan, f32) used only to validate the Pallas kernel.
# ----------------------------------------------------------------------------
def _lstm_dir_ref(x, w_ih, w_hh, b_ih, b_hh):
    H = w_hh.shape[1]
    B = x.shape[1]

    def step(carry, x_t):
        h, c = carry
        gates = x_t @ w_ih.T + h @ w_hh.T + b_ih + b_hh
        i = jax.nn.sigmoid(gates[:, 0:H])
        f = jax.nn.sigmoid(gates[:, H:2 * H])
        g = jnp.tanh(gates[:, 2 * H:3 * H])
        o = jax.nn.sigmoid(gates[:, 3 * H:4 * H])
        c = f * c + i * g
        h = o * jnp.tanh(c)
        return (h, c), h

    init = (jnp.zeros((B, H), jnp.float32), jnp.zeros((B, H), jnp.float32))
    (h_T, c_T), out = lax.scan(step, init, x)
    return out, h_T, c_T


def encoder_forward_ref(inp, params, bidi=True):
    x = inp
    h_layers, c_layers = [], []
    for dirs in params:
        out_f, h_f, c_f = _lstm_dir_ref(x, *dirs[0])
        if bidi:
            out_b_rev, h_b, c_b = _lstm_dir_ref(x[::-1], *dirs[1])
            out_b = out_b_rev[::-1]
            x = jnp.concatenate([out_f, out_b], axis=-1)
            h_layers.append(jnp.concatenate([h_f, h_b], axis=-1))
            c_layers.append(jnp.concatenate([c_f, c_b], axis=-1))
        else:
            x = out_f
            h_layers.append(h_f)
            c_layers.append(c_f)
    return x, (jnp.stack(h_layers, 0), jnp.stack(c_layers, 0))


def _check(inp, params, bidi, time_chunk, hid_dim, num_layers):
    T, B, _ = inp.shape
    outs, (h_t, c_t) = encoder_forward(inp, params, bidi=bidi, time_chunk=time_chunk)
    outs = jax.block_until_ready(outs)
    h_t = jax.block_until_ready(h_t)
    c_t = jax.block_until_ready(c_t)

    assert outs.shape == (T, B, hid_dim)
    assert h_t.shape == (num_layers, B, hid_dim)
    assert c_t.shape == (num_layers, B, hid_dim)

    outs_r, (h_r, c_r) = encoder_forward_ref(inp, params, bidi=bidi)
    # bf16 gates/matmuls inside the kernel -> looser tolerance vs f32 reference
    # (gate math and cell-state update stay in f32, so drift is bounded).
    np.testing.assert_allclose(np.asarray(outs), np.asarray(outs_r), rtol=5e-2, atol=5e-2)
    np.testing.assert_allclose(np.asarray(h_t), np.asarray(h_r), rtol=5e-2, atol=5e-2)
    np.testing.assert_allclose(np.asarray(c_t), np.asarray(c_r), rtol=5e-2, atol=5e-2)


if __name__ == "__main__":
    # Encoder(in_dim=32, hid_dim=64, num_layers=2, cell='LSTM', dropout=0.0, bidi=True)
    seq_len, batch, in_dim = 8, 4, 32
    hid_dim, num_layers, bidi = 64, 2, True

    key = jax.random.PRNGKey(0)
    key, k_inp = jax.random.split(key)
    inp = jax.random.normal(k_inp, (seq_len, batch, in_dim), jnp.float32)
    params = init_encoder_params(key, in_dim, hid_dim, num_layers, bidi=bidi)

    # Main case: exercises the time-chunk pipeline (2 chunks) + batch padding.
    _check(inp, params, bidi, time_chunk=4, hid_dim=hid_dim, num_layers=num_layers)

    # Second case: seq not a multiple of the chunk -> exercises the in-kernel
    # padded-timestep freeze for both directions.
    key, k_inp2 = jax.random.split(key)
    inp2 = jax.random.normal(k_inp2, (7, 3, 16), jnp.float32)
    params2 = init_encoder_params(key, 16, 32, 1, bidi=True)
    _check(inp2, params2, True, time_chunk=4, hid_dim=32, num_layers=1)

    print("KERNEL_OK")
</pallas_src>

<mosaic_0001>
module attributes {stable_mosaic.version = 11 : i64} {
  func.func @lstm_dir_kernel(%arg0: i32, %arg1: i32, %arg2: memref<1x4x8x128xbf16, #tpu.memory_space<vmem>>, %arg3: memref<1x32x128xbf16, #tpu.memory_space<vmem>>, %arg4: memref<1x4x8x32xf32, #tpu.memory_space<vmem>>, %arg5: memref<1x8x32xf32, #tpu.memory_space<vmem>>, %arg6: memref<1x8x32xf32, #tpu.memory_space<vmem>>, %arg7: memref<8x32xf32, #tpu.memory_space<vmem>>, %arg8: memref<8x32xf32, #tpu.memory_space<vmem>>) attributes {dimension_semantics = [#tpu.dimension_semantics<parallel>, #tpu.dimension_semantics<arbitrary>], iteration_bounds = array<i64: 2, 2>, scalar_prefetch = 0 : i64, scratch_operands = 2 : i64, tpu.core_type = #tpu.core_type<tc>, window_params = [{transform_indices = @transform_0, window_bounds = array<i64: 1, 4, 8, 128>}, {transform_indices = @transform_1, window_bounds = array<i64: 1, 32, 128>}, {transform_indices = @transform_2, window_bounds = array<i64: 1, 4, 8, 32>}, {transform_indices = @transform_3, window_bounds = array<i64: 1, 8, 32>}, {transform_indices = @transform_4, window_bounds = array<i64: 1, 8, 32>}]} {
    %c1_i32 = arith.constant 1 : i32
    %0 = arith.cmpi eq, %arg0, %c1_i32 : i32
    %c0_i32 = arith.constant 0 : i32
    %1 = arith.cmpi eq, %arg1, %c0_i32 : i32
    %2 = arith.extui %1 : i1 to i32
    %c0_i32_0 = arith.constant 0 : i32
    %3 = arith.cmpi ne, %2, %c0_i32_0 : i32
    scf.if %3 {
      %cst_62 = arith.constant 0.000000e+00 : f32
      %168 = vector.broadcast %cst_62 : f32 to vector<8x32xf32>
      %c0_63 = arith.constant 0 : index
      %c0_64 = arith.constant 0 : index
      %169 = vector.load %arg7[%c0_63, %c0_64] : memref<8x32xf32, #tpu.memory_space<vmem>>, vector<8x32xf32>
      tpu.vector_store %arg7[%c0_63, %c0_64], %168 {strides = array<i32>} : memref<8x32xf32, #tpu.memory_space<vmem>>, vector<8x32xf32>,
      %cst_65 = arith.constant 0.000000e+00 : f32
      %170 = vector.broadcast %cst_65 : f32 to vector<8x32xf32>
      %c0_66 = arith.constant 0 : index
      %c0_67 = arith.constant 0 : index
      %171 = vector.load %arg8[%c0_66, %c0_67] : memref<8x32xf32, #tpu.memory_space<vmem>>, vector<8x32xf32>
      tpu.vector_store %arg8[%c0_66, %c0_67], %170 {strides = array<i32>} : memref<8x32xf32, #tpu.memory_space<vmem>>, vector<8x32xf32>,
    } else {
    }
    %c0 = arith.constant 0 : index
    %c0_1 = arith.constant 0 : index
    %c0_2 = arith.constant 0 : index
    %4 = vector.load %arg3[%c0, %c0_1, %c0_2] : memref<1x32x128xbf16, #tpu.memory_space<vmem>>, vector<1x32x128xbf16>
    %5 = vector.shape_cast %4 : vector<1x32x128xbf16> to vector<32x128xbf16>
    %c0_3 = arith.constant 0 : index
    %c0_4 = arith.constant 0 : index
    %6 = vector.load %arg7[%c0_3, %c0_4] : memref<8x32xf32, #tpu.memory_space<vmem>>, vector<8x32xf32>
    %c0_5 = arith.constant 0 : index
    %c0_6 = arith.constant 0 : index
    %7 = vector.load %arg8[%c0_5, %c0_6] : memref<8x32xf32, #tpu.memory_space<vmem>>, vector<8x32xf32>
    %c0_i32_7 = arith.constant 0 : i32
    %c3_i32 = arith.constant 3 : i32
    %8 = arith.subi %c3_i32, %c0_i32_7 : i32
    %9 = arith.select %0, %8, %c0_i32_7 : i32
    %c0_8 = arith.constant 0 : index
    %10 = arith.index_cast %9 : i32 to index
    %c0_9 = arith.constant 0 : index
    %c0_10 = arith.constant 0 : index
    %11 = vector.load %arg2[%c0_8, %10, %c0_9, %c0_10] : memref<1x4x8x128xbf16, #tpu.memory_space<vmem>>, vector<1x1x8x128xbf16>
    %12 = vector.shape_cast %11 : vector<1x1x8x128xbf16> to vector<8x128xbf16>
    %13 = arith.extf %12 : vector<8x128xbf16> to vector<8x128xf32>
    %14 = arith.truncf %6 : vector<8x32xf32> to vector<8x32xbf16>
    %cst = arith.constant dense<0.000000e+00> : vector<8x128xf32>
    %15 = tpu.matmul %14, %5, %cst {dimension_numbers = #tpu.dot_dimension_numbers<[1], [0], [0], [1], [0, 0, 1, 1], [], []>} : vector<8x32xbf16>, vector<32x128xbf16>, vector<8x128xf32> -> vector<8x128xf32>
    %16 = arith.addf %13, %15 : vector<8x128xf32>
    %17 = vector.extract_strided_slice %16 {offsets = [0, 0], sizes = [8, 32], strides = [1, 1]} : vector<8x128xf32> to vector<8x32xf32>
    %18 = arith.negf %17 : vector<8x32xf32>
    %19 = math.exp %18 : vector<8x32xf32>
    %cst_11 = arith.constant 1.000000e+00 : f32
    %20 = vector.broadcast %cst_11 : f32 to vector<8x32xf32>
    %21 = arith.addf %20, %19 : vector<8x32xf32>
    %22 = arith.divf %20, %21 : vector<8x32xf32>
    %23 = vector.extract_strided_slice %16 {offsets = [0, 32], sizes = [8, 32], strides = [1, 1]} : vector<8x128xf32> to vector<8x32xf32>
    %24 = arith.negf %23 : vector<8x32xf32>
    %25 = math.exp %24 : vector<8x32xf32>
    %cst_12 = arith.constant 1.000000e+00 : f32
    %26 = vector.broadcast %cst_12 : f32 to vector<8x32xf32>
    %27 = arith.addf %26, %25 : vector<8x32xf32>
    %28 = arith.divf %26, %27 : vector<8x32xf32>
    %29 = vector.extract_strided_slice %16 {offsets = [0, 64], sizes = [8, 32], strides = [1, 1]} : vector<8x128xf32> to vector<8x32xf32>
    %30 = math.tanh %29 : vector<8x32xf32>
    %31 = vector.extract_strided_slice %16 {offsets = [0, 96], sizes = [8, 32], strides = [1, 1]} : vector<8x128xf32> to vector<8x32xf32>
    %32 = arith.negf %31 : vector<8x32xf32>
    %33 = math.exp %32 : vector<8x32xf32>
    %cst_13 = arith.constant 1.000000e+00 : f32
    %34 = vector.broadcast %cst_13 : f32 to vector<8x32xf32>
    %35 = arith.addf %34, %33 : vector<8x32xf32>
    %36 = arith.divf %34, %35 : vector<8x32xf32>
    %37 = arith.mulf %28, %7 : vector<8x32xf32>
    %38 = arith.mulf %22, %30 : vector<8x32xf32>
    %39 = arith.addf %37, %38 : vector<8x32xf32>
    %40 = math.tanh %39 : vector<8x32xf32>
    %41 = arith.mulf %36, %40 : vector<8x32xf32>
    %c0_14 = arith.constant 0 : index
    %42 = arith.index_cast %9 : i32 to index
    %c0_15 = arith.constant 0 : index
    %c0_16 = arith.constant 0 : index
    %43 = vector.load %arg4[%c0_14, %42, %c0_15, %c0_16] : memref<1x4x8x32xf32, #tpu.memory_space<vmem>>, vector<1x1x8x32xf32>
    %44 = vector.shape_cast %43 : vector<1x1x8x32xf32> to vector<8x32xf32>
    %45 = vector.shape_cast %41 : vector<8x32xf32> to vector<1x1x8x32xf32>
    tpu.vector_store %arg4[%c0_14, %42, %c0_15, %c0_16], %45 {strides = array<i32>} : memref<1x4x8x32xf32, #tpu.memory_space<vmem>>, vector<1x1x8x32xf32>,
    %c1_i32_17 = arith.constant 1 : i32
    %c3_i32_18 = arith.constant 3 : i32
    %46 = arith.subi %c3_i32_18, %c1_i32_17 : i32
    %47 = arith.select %0, %46, %c1_i32_17 : i32
    %c0_19 = arith.constant 0 : index
    %48 = arith.index_cast %47 : i32 to index
    %c0_20 = arith.constant 0 : index
    %c0_21 = arith.constant 0 : index
    %49 = vector.load %arg2[%c0_19, %48, %c0_20, %c0_21] : memref<1x4x8x128xbf16, #tpu.memory_space<vmem>>, vector<1x1x8x128xbf16>
    %50 = vector.shape_cast %49 : vector<1x1x8x128xbf16> to vector<8x128xbf16>
    %51 = arith.extf %50 : vector<8x128xbf16> to vector<8x128xf32>
    %52 = arith.truncf %41 : vector<8x32xf32> to vector<8x32xbf16>
    %cst_22 = arith.constant dense<0.000000e+00> : vector<8x128xf32>
    %53 = tpu.matmul %52, %5, %cst_22 {dimension_numbers = #tpu.dot_dimension_numbers<[1], [0], [0], [1], [0, 0, 1, 1], [], []>} : vector<8x32xbf16>, vector<32x128xbf16>, vector<8x128xf32> -> vector<8x128xf32>
    %54 = arith.addf %51, %53 : vector<8x128xf32>
    %55 = vector.extract_strided_slice %54 {offsets = [0, 0], sizes = [8, 32], strides = [1, 1]} : vector<8x128xf32> to vector<8x32xf32>
    %56 = arith.negf %55 : vector<8x32xf32>
    %57 = math.exp %56 : vector<8x32xf32>
    %cst_23 = arith.constant 1.000000e+00 : f32
    %58 = vector.broadcast %cst_23 : f32 to vector<8x32xf32>
    %59 = arith.addf %58, %57 : vector<8x32xf32>
    %60 = arith.divf %58, %59 : vector<8x32xf32>
    %61 = vector.extract_strided_slice %54 {offsets = [0, 32], sizes = [8, 32], strides = [1, 1]} : vector<8x128xf32> to vector<8x32xf32>
    %62 = arith.negf %61 : vector<8x32xf32>
    %63 = math.exp %62 : vector<8x32xf32>
    %cst_24 = arith.constant 1.000000e+00 : f32
    %64 = vector.broadcast %cst_24 : f32 to vector<8x32xf32>
    %65 = arith.addf %64, %63 : vector<8x32xf32>
    %66 = arith.divf %64, %65 : vector<8x32xf32>
    %67 = vector.extract_strided_slice %54 {offsets = [0, 64], sizes = [8, 32], strides = [1, 1]} : vector<8x128xf32> to vector<8x32xf32>
    %68 = math.tanh %67 : vector<8x32xf32>
    %69 = vector.extract_strided_slice %54 {offsets = [0, 96], sizes = [8, 32], strides = [1, 1]} : vector<8x128xf32> to vector<8x32xf32>
    %70 = arith.negf %69 : vector<8x32xf32>
    %71 = math.exp %70 : vector<8x32xf32>
    %cst_25 = arith.constant 1.000000e+00 : f32
    %72 = vector.broadcast %cst_25 : f32 to vector<8x32xf32>
    %73 = arith.addf %72, %71 : vector<8x32xf32>
    %74 = arith.divf %72, %73 : vector<8x32xf32>
    %75 = arith.mulf %66, %39 : vector<8x32xf32>
    %76 = arith.mulf %60, %68 : vector<8x32xf32>
    %77 = arith.addf %75, %76 : vector<8x32xf32>
    %78 = math.tanh %77 : vector<8x32xf32>
    %79 = arith.mulf %74, %78 : vector<8x32xf32>
    %c0_26 = arith.constant 0 : index
    %80 = arith.index_cast %47 : i32 to index
    %c0_27 = arith.constant 0 : index
    %c0_28 = arith.constant 0 : index
    %81 = vector.load %arg4[%c0_26, %80, %c0_27, %c0_28] : memref<1x4x8x32xf32, #tpu.memory_space<vmem>>, vector<1x1x8x32xf32>
    %82 = vector.shape_cast %81 : vector<1x1x8x32xf32> to vector<8x32xf32>
    %83 = vector.shape_cast %79 : vector<8x32xf32> to vector<1x1x8x32xf32>
    tpu.vector_store %arg4[%c0_26, %80, %c0_27, %c0_28], %83 {strides = array<i32>} : memref<1x4x8x32xf32, #tpu.memory_space<vmem>>, vector<1x1x8x32xf32>,
    %c2_i32 = arith.constant 2 : i32
    %c3_i32_29 = arith.constant 3 : i32
    %84 = arith.subi %c3_i32_29, %c2_i32 : i32
    %85 = arith.select %0, %84, %c2_i32 : i32
    %c0_30 = arith.constant 0 : index
    %86 = arith.index_cast %85 : i32 to index
    %c0_31 = arith.constant 0 : index
    %c0_32 = arith.constant 0 : index
    %87 = vector.load %arg2[%c0_30, %86, %c0_31, %c0_32] : memref<1x4x8x128xbf16, #tpu.memory_space<vmem>>, vector<1x1x8x128xbf16>
    %88 = vector.shape_cast %87 : vector<1x1x8x128xbf16> to vector<8x128xbf16>
    %89 = arith.extf %88 : vector<8x128xbf16> to vector<8x128xf32>
    %90 = arith.truncf %79 : vector<8x32xf32> to vector<8x32xbf16>
    %cst_33 = arith.constant dense<0.000000e+00> : vector<8x128xf32>
    %91 = tpu.matmul %90, %5, %cst_33 {dimension_numbers = #tpu.dot_dimension_numbers<[1], [0], [0], [1], [0, 0, 1, 1], [], []>} : vector<8x32xbf16>, vector<32x128xbf16>, vector<8x128xf32> -> vector<8x128xf32>
    %92 = arith.addf %89, %91 : vector<8x128xf32>
    %93 = vector.extract_strided_slice %92 {offsets = [0, 0], sizes = [8, 32], strides = [1, 1]} : vector<8x128xf32> to vector<8x32xf32>
    %94 = arith.negf %93 : vector<8x32xf32>
    %95 = math.exp %94 : vector<8x32xf32>
    %cst_34 = arith.constant 1.000000e+00 : f32
    %96 = vector.broadcast %cst_34 : f32 to vector<8x32xf32>
    %97 = arith.addf %96, %95 : vector<8x32xf32>
    %98 = arith.divf %96, %97 : vector<8x32xf32>
    %99 = vector.extract_strided_slice %92 {offsets = [0, 32], sizes = [8, 32], strides = [1, 1]} : vector<8x128xf32> to vector<8x32xf32>
    %100 = arith.negf %99 : vector<8x32xf32>
    %101 = math.exp %100 : vector<8x32xf32>
    %cst_35 = arith.constant 1.000000e+00 : f32
    %102 = vector.broadcast %cst_35 : f32 to vector<8x32xf32>
    %103 = arith.addf %102, %101 : vector<8x32xf32>
    %104 = arith.divf %102, %103 : vector<8x32xf32>
    %105 = vector.extract_strided_slice %92 {offsets = [0, 64], sizes = [8, 32], strides = [1, 1]} : vector<8x128xf32> to vector<8x32xf32>
    %106 = math.tanh %105 : vector<8x32xf32>
    %107 = vector.extract_strided_slice %92 {offsets = [0, 96], sizes = [8, 32], strides = [1, 1]} : vector<8x128xf32> to vector<8x32xf32>
    %108 = arith.negf %107 : vector<8x32xf32>
    %109 = math.exp %108 : vector<8x32xf32>
    %cst_36 = arith.constant 1.000000e+00 : f32
    %110 = vector.broadcast %cst_36 : f32 to vector<8x32xf32>
    %111 = arith.addf %110, %109 : vector<8x32xf32>
    %112 = arith.divf %110, %111 : vector<8x32xf32>
    %113 = arith.mulf %104, %77 : vector<8x32xf32>
    %114 = arith.mulf %98, %106 : vector<8x32xf32>
    %115 = arith.addf %113, %114 : vector<8x32xf32>
    %116 = math.tanh %115 : vector<8x32xf32>
    %117 = arith.mulf %112, %116 : vector<8x32xf32>
    %c0_37 = arith.constant 0 : index
    %118 = arith.index_cast %85 : i32 to index
    %c0_38 = arith.constant 0 : index
    %c0_39 = arith.constant 0 : index
    %119 = vector.load %arg4[%c0_37, %118, %c0_38, %c0_39] : memref<1x4x8x32xf32, #tpu.memory_space<vmem>>, vector<1x1x8x32xf32>
    %120 = vector.shape_cast %119 : vector<1x1x8x32xf32> to vector<8x32xf32>
    %121 = vector.shape_cast %117 : vector<8x32xf32> to vector<1x1x8x32xf32>
    tpu.vector_store %arg4[%c0_37, %118, %c0_38, %c0_39], %121 {strides = array<i32>} : memref<1x4x8x32xf32, #tpu.memory_space<vmem>>, vector<1x1x8x32xf32>,
    %c3_i32_40 = arith.constant 3 : i32
    %c3_i32_41 = arith.constant 3 : i32
    %122 = arith.subi %c3_i32_41, %c3_i32_40 : i32
    %123 = arith.select %0, %122, %c3_i32_40 : i32
    %c0_42 = arith.constant 0 : index
    %124 = arith.index_cast %123 : i32 to index
    %c0_43 = arith.constant 0 : index
    %c0_44 = arith.constant 0 : index
    %125 = vector.load %arg2[%c0_42, %124, %c0_43, %c0_44] : memref<1x4x8x128xbf16, #tpu.memory_space<vmem>>, vector<1x1x8x128xbf16>
    %126 = vector.shape_cast %125 : vector<1x1x8x128xbf16> to vector<8x128xbf16>
    %127 = arith.extf %126 : vector<8x128xbf16> to vector<8x128xf32>
    %128 = arith.truncf %117 : vector<8x32xf32> to vector<8x32xbf16>
    %cst_45 = arith.constant dense<0.000000e+00> : vector<8x128xf32>
    %129 = tpu.matmul %128, %5, %cst_45 {dimension_numbers = #tpu.dot_dimension_numbers<[1], [0], [0], [1], [0, 0, 1, 1], [], []>} : vector<8x32xbf16>, vector<32x128xbf16>, vector<8x128xf32> -> vector<8x128xf32>
    %130 = arith.addf %127, %129 : vector<8x128xf32>
    %131 = vector.extract_strided_slice %130 {offsets = [0, 0], sizes = [8, 32], strides = [1, 1]} : vector<8x128xf32> to vector<8x32xf32>
    %132 = arith.negf %131 : vector<8x32xf32>
    %133 = math.exp %132 : vector<8x32xf32>
    %cst_46 = arith.constant 1.000000e+00 : f32
    %134 = vector.broadcast %cst_46 : f32 to vector<8x32xf32>
    %135 = arith.addf %134, %133 : vector<8x32xf32>
    %136 = arith.divf %134, %135 : vector<8x32xf32>
    %137 = vector.extract_strided_slice %130 {offsets = [0, 32], sizes = [8, 32], strides = [1, 1]} : vector<8x128xf32> to vector<8x32xf32>
    %138 = arith.negf %137 : vector<8x32xf32>
    %139 = math.exp %138 : vector<8x32xf32>
    %cst_47 = arith.constant 1.000000e+00 : f32
    %140 = vector.broadcast %cst_47 : f32 to vector<8x32xf32>
    %141 = arith.addf %140, %139 : vector<8x32xf32>
    %142 = arith.divf %140, %141 : vector<8x32xf32>
    %143 = vector.extract_strided_slice %130 {offsets = [0, 64], sizes = [8, 32], strides = [1, 1]} : vector<8x128xf32> to vector<8x32xf32>
    %144 = math.tanh %143 : vector<8x32xf32>
    %145 = vector.extract_strided_slice %130 {offsets = [0, 96], sizes = [8, 32], strides = [1, 1]} : vector<8x128xf32> to vector<8x32xf32>
    %146 = arith.negf %145 : vector<8x32xf32>
    %147 = math.exp %146 : vector<8x32xf32>
    %cst_48 = arith.constant 1.000000e+00 : f32
    %148 = vector.broadcast %cst_48 : f32 to vector<8x32xf32>
    %149 = arith.addf %148, %147 : vector<8x32xf32>
    %150 = arith.divf %148, %149 : vector<8x32xf32>
    %151 = arith.mulf %142, %115 : vector<8x32xf32>
    %152 = arith.mulf %136, %144 : vector<8x32xf32>
    %153 = arith.addf %151, %152 : vector<8x32xf32>
    %154 = math.tanh %153 : vector<8x32xf32>
    %155 = arith.mulf %150, %154 : vector<8x32xf32>
    %c0_49 = arith.constant 0 : index
    %156 = arith.index_cast %123 : i32 to index
    %c0_50 = arith.constant 0 : index
    %c0_51 = arith.constant 0 : index
    %157 = vector.load %arg4[%c0_49, %156, %c0_50, %c0_51] : memref<1x4x8x32xf32, #tpu.memory_space<vmem>>, vector<1x1x8x32xf32>
    %158 = vector.shape_cast %157 : vector<1x1x8x32xf32> to vector<8x32xf32>
    %159 = vector.shape_cast %155 : vector<8x32xf32> to vector<1x1x8x32xf32>
    tpu.vector_store %arg4[%c0_49, %156, %c0_50, %c0_51], %159 {strides = array<i32>} : memref<1x4x8x32xf32, #tpu.memory_space<vmem>>, vector<1x1x8x32xf32>,
    %c4_i32 = arith.constant 4 : i32
    %c0_52 = arith.constant 0 : index
    %c0_53 = arith.constant 0 : index
    %160 = vector.load %arg7[%c0_52, %c0_53] : memref<8x32xf32, #tpu.memory_space<vmem>>, vector<8x32xf32>
    tpu.vector_store %arg7[%c0_52, %c0_53], %155 {strides = array<i32>} : memref<8x32xf32, #tpu.memory_space<vmem>>, vector<8x32xf32>,
    %c0_54 = arith.constant 0 : index
    %c0_55 = arith.constant 0 : index
    %161 = vector.load %arg8[%c0_54, %c0_55] : memref<8x32xf32, #tpu.memory_space<vmem>>, vector<8x32xf32>
    tpu.vector_store %arg8[%c0_54, %c0_55], %153 {strides = array<i32>} : memref<8x32xf32, #tpu.memory_space<vmem>>, vector<8x32xf32>,
    %c0_56 = arith.constant 0 : index
    %c0_57 = arith.constant 0 : index
    %c0_58 = arith.constant 0 : index
    %162 = vector.load %arg5[%c0_56, %c0_57, %c0_58] : memref<1x8x32xf32, #tpu.memory_space<vmem>>, vector<1x8x32xf32>
    %163 = vector.shape_cast %162 : vector<1x8x32xf32> to vector<8x32xf32>
    %164 = vector.shape_cast %155 : vector<8x32xf32> to vector<1x8x32xf32>
    tpu.vector_store %arg5[%c0_56, %c0_57, %c0_58], %164 {strides = array<i32>} : memref<1x8x32xf32, #tpu.memory_space<vmem>>, vector<1x8x32xf32>,
    %c0_59 = arith.constant 0 : index
    %c0_60 = arith.constant 0 : index
    %c0_61 = arith.constant 0 : index
    %165 = vector.load %arg6[%c0_59, %c0_60, %c0_61] : memref<1x8x32xf32, #tpu.memory_space<vmem>>, vector<1x8x32xf32>
    %166 = vector.shape_cast %165 : vector<1x8x32xf32> to vector<8x32xf32>
    %167 = vector.shape_cast %153 : vector<8x32xf32> to vector<1x8x32xf32>
    tpu.vector_store %arg6[%c0_59, %c0_60, %c0_61], %167 {strides = array<i32>} : memref<1x8x32xf32, #tpu.memory_space<vmem>>, vector<1x8x32xf32>,
    return
  }
  func.func @transform_0(%arg0: i32, %arg1: i32) -> (i32, i32, i32, i32) {
    %c2_i32 = arith.constant 2 : i32
    %0 = arith.muli %c2_i32, %arg1 : i32
    %c1_i32 = arith.constant 1 : i32
    %1 = arith.subi %c1_i32, %0 : i32
    %2 = arith.muli %arg0, %1 : i32
    %3 = arith.addi %2, %arg1 : i32
    %c0_i32 = arith.constant 0 : i32
    %c0_i32_0 = arith.constant 0 : i32
    %c0_i32_1 = arith.constant 0 : i32
    return %arg0, %3, %c0_i32, %c0_i32_0 : i32, i32, i32, i32
  }
  func.func @transform_1(%arg0: i32, %arg1: i32) -> (i32, i32, i32) {
    %c0_i32 = arith.constant 0 : i32
    %c0_i32_0 = arith.constant 0 : i32
    %c0_i32_1 = arith.constant 0 : i32
    return %arg0, %c0_i32, %c0_i32_0 : i32, i32, i32
  }
  func.func @transform_2(%arg0: i32, %arg1: i32) -> (i32, i32, i32, i32) {
    %c2_i32 = arith.constant 2 : i32
    %0 = arith.muli %c2_i32, %arg1 : i32
    %c1_i32 = arith.constant 1 : i32
    %1 = arith.subi %c1_i32, %0 : i32
    %2 = arith.muli %arg0, %1 : i32
    %3 = arith.addi %2, %arg1 : i32
    %c0_i32 = arith.constant 0 : i32
    %c0_i32_0 = arith.constant 0 : i32
    %c0_i32_1 = arith.constant 0 : i32
    return %arg0, %3, %c0_i32, %c0_i32_0 : i32, i32, i32, i32
  }
  func.func @transform_3(%arg0: i32, %arg1: i32) -> (i32, i32, i32) {
    %c0_i32 = arith.constant 0 : i32
    %c0_i32_0 = arith.constant 0 : i32
    %c0_i32_1 = arith.constant 0 : i32
    return %arg0, %c0_i32, %c0_i32_0 : i32, i32, i32
  }
  func.func @transform_4(%arg0: i32, %arg1: i32) -> (i32, i32, i32) {
    %c0_i32 = arith.constant 0 : i32
    %c0_i32_0 = arith.constant 0 : i32
    %c0_i32_1 = arith.constant 0 : i32
    return %arg0, %c0_i32, %c0_i32_0 : i32, i32, i32
  }
}

</mosaic_0001>

<bundles_post_ra>
// kernel: tpu_custom_call.1
= control target key start
LH: loop header
LB: loop body
LE: loop exit
PB: predicated region body
PF: predicated region fallthrough
CT: control target
= control target key end

     0   :  { %s2019_s0 = inlined_call_operand.hbm [shape: bf16[2,8,8,128], index: 0, kind: input, shape index: {}]   ;;  %s2020_s1 = inlined_call_operand.hbm [shape: bf16[2,32,128], index: 1, kind: input, shape index: {}]   ;;  %s2021_s2 = inlined_call_operand.hbm [shape: f32[2,8,8,32], index: 2, kind: output, shape index: {0}]   ;;  %s2022_s3 = inlined_call_operand.hbm [shape: f32[2,8,32], index: 3, kind: output, shape index: {1}]   ;;  %s2023_s4 = inlined_call_operand.hbm [shape: f32[2,8,32], index: 4, kind: output, shape index: {2}]  }
   0x1   :  { %2047 = sst [smem:[#allocation28_spill]] %s2019_s0 }
   0x2   :  { %2048 = sst [smem:[#allocation29_spill]] %s2020_s1 }
   0x3   :  { %2049 = sst [smem:[#allocation30_spill]] %s2021_s2 }
   0x4   :  { %2050 = sst [smem:[#allocation31_spill]] %s2023_s4 }
   0x5   :  { %10 = vsyncpa [#allocation5], 0 }
   0x6   :  { %12 = vsyncpa [#allocation5 + $0x1], 0 }
   0x7   :  { %13 = vsyncpa [#allocation8], 0 }
   0x8   :  { %15 = vsyncpa [#allocation8 + $0x1], 0 }
   0x9   :  { %16 = vsyncpa [#allocation6], 0 }
   0xa   :  { %18 = vsyncpa [#allocation6 + $0x1], 0 }
   0xb   :  { %19 = vsyncpa [#allocation11], 0 }
   0xc   :  { %21 = vsyncpa [#allocation11 + $0x1], 0  ;;  %s1489_s15 = smov 0   ;;  %s1491_s16 = smov 0  }
   0xd   :  { %s1493_s17 = smov 0   ;;  %s1495_s18 = smov 0  }
   0xe   :  { %s1497_s19 = smov 0   ;;  %s1499_s20 = smov 0  }
   0xf   :  { %s1501_s21 = smov 0   ;;  %s1503_s22 = smov 0  }
  0x10   :  { %s1505_s23 = smov 0   ;;  %s1507_s24 = smov 0  }
  0x11   :  { %s1509_s25 = smov 0  }
  0x12 LB: > { %2051 = sst [smem:[#allocation17_spill]] %s1411_s16  ;;  %s1545_s26 = sadd.s32 4294967295, %s1447_s25   ;;  %s1447_s25 = sphi %s1509_s25, %s27_s25   ;;  %s1443_s24 = sphi %s1507_s24, %s2103_s24   ;;  %s1439_s23 = sphi %s1505_s23, %s2102_s23   ;;  %s1435_s22 = sphi %s1503_s22, %s2101_s22   ;;  %s1431_s21 = sphi %s1501_s21, %s2100_s21   ;;  %s1427_s20 = sphi %s1499_s20, %s2099_s20   ;;  %s1423_s19 = sphi %s1497_s19, %s2098_s19   ;;  %s1419_s18 = sphi %s1495_s18, %s2097_s18   ;;  %s1415_s17 = sphi %s1493_s17, %s2096_s17   ;;  %s1411_s16 = sphi %s1491_s16, %s2095_s16   ;;  %s1407_s15 = sphi %s1489_s15, %s2094_s15  }
  0x13   : > { %2052 = sst [smem:[#allocation18_spill]] %s1415_s17  ;;  %s2024_s27 = sadd.s32 4294967294, %s1447_s25  }
  0x14   : > { %2053 = sst [smem:[#allocation19_spill]] %s1423_s19  ;;  %s36_s28 = sadd.s32 1, %s1439_s23 }
  0x15   : > { %2054 = sst [smem:[#allocation20_spill]] %s1427_s20  ;;  %s39_s29 = sadd.s32 1, %s1443_s24 }
  0x16   : > { %2055 = sst [smem:[#allocation21_spill]] %s1439_s23  ;;  %p37_p0 = scmp.ge.s32.totalorder %s36_s28, 2 }
  0x17   : > { %2056 = sst [smem:[#allocation22_spill]] %s1443_s24  ;;  %s945_s30 = sshll.u32 %s1439_s23, 1 }
  0x18   : > { %s44_s5 = ssub.s32 1, %s945_s30  ;;  %s56_s6 = sadd.s32 1, %s1427_s20 }
  0x19   : > { %s2105_s28 = smov (%p37_p0, %s36_s28), 0  ;;  %s2107_s29 = smov (!%p37_p0, %s39_s29), %s1443_s24 }
  0x1a   : > { %2057 = sst [smem:[#allocation23_spill]] %s2105_s28  ;;  %s45_s7 = smul.u32 %s1443_s24, %s44_s5 }
  0x1b   : > { %s946_s8 = sshll.u32 %s2105_s28, 1  ;;  %p41_p1 = scmp.ge.s32.totalorder %s2107_s29, 2 }
  0x1c   : > { %s48_s9 = ssub.s32 1, %s946_s8  ;;  %s46_s10 = sadd.s32 %s1439_s23, %s45_s7 }
  0x1d   : > { %p63_p2 = scmp.ne.s32.totalorder %s1427_s20, %s1423_s19  ;;  %s2109_s29 = smov (%p41_p1, %s2107_s29), 0 }
  0x1e   : > { %2058 = sst [smem:[#allocation24_spill]] %s2109_s29  ;;  %p2035_p3 = scmp.eq.s32.totalorder %s1447_s25, 0 }
  0x1f   : > { %p69_p4 = scmp.ne.s32.totalorder %s1423_s19, %s1419_s18  ;;  %s49_s11 = smul.u32 %s48_s9, %s2109_s29 }
  0x20   : > { %s1568_s12 = ssub.s32 %s1443_s24, %s2109_s29  ;;  %p1575_p5 = por %p2035_p3, %p63_p2 }
  0x21   : > { %p2032_p6 = scmp.eq.s32.totalorder %s1545_s26, 0  ;;  %s50_s14 = sadd.s32 %s49_s11, %s2105_s28 }
  0x22   : > { %s52_s30 = ssub.s32 %s46_s10, %s50_s14  ;;  %p2033_p9 = scmp.eq.s32.totalorder %s1545_s26, 3 }
  0x23   : > { %p1587_p8 = por %p2032_p6, %p69_p4  ;;  %s53_s7 = sor.u32 %s52_s30, %s1568_s12 }
  0x24   : > { %p54_p10 = scmp.eq.s32.totalorder %s53_s7, 0  ;;  %p1595_p11 = scmp.eq.s32.totalorder %s2024_s27, 3 }
  0x25   : > { %s2060_s5 = scalar_select %p1587_p8, 1, 0 }
  0x26   : > { %p1604_p12 = por %p2033_p9, %p63_p2  ;;  %p1616_p13 = por %p1595_p11, %p69_p4 }
  0x27   : > { %s1609_s11 = scalar_select %p54_p10, %s1427_s20, %s56_s6  }
  0x28   : > { %s2062_s9 = scalar_select %p1604_p12, 1, 0 }
  0x29   : > { %2064 = sst [smem:[#allocation26_spill]] %s1609_s11  ;;  %p2034_p0 = scmp.lt.s32.totalorder %s1447_s25, 4 }
  0x2a   : > { %2063 = sst [smem:[#allocation25_spill]] %s2062_s9  ;;  %s207_s30 = sand.u32 1, %s1427_s20  }
  0x2b   : > { %s2065_s14 = scalar_select %p1616_p13, 1, 0 }
  0x2c   : > { %s953_s7 = sshll.u32 %s46_s10, 2  ;;  %s951_s27 = sshll.u32 %s207_s30, 4 }
  0x2d   : > { %s954_s29 = sshll.u32 %s1443_s24, 3  ;;  %s211_s23 = scalar_lea.vmem [#allocation4], %s951_s27 }
  0x2e   : > { %s221_s28 = sadd.s32 %s954_s29, %s953_s7  ;;  %s224_s4 = sshll.u32 %s211_s23, 4  ;;  %s1623_s4 = int_to_ptr.vmem [resolvable:$true] %s224_s4 }
  0x2f   : > { %s955_s2 = sshll.u32 %s221_s28, 6  ;;  %s2066_s0 = sld [smem:[#allocation28_spill]] }
  0x30   : > { %p1634_p1 = pnand %p2034_p0, %p1575_p5  ;;  %s1639_s23 = scalar_lea.sflag [#allocation5], %s207_s30 }
  0x32   : > { %p1203_p10 = pneg %p1634_p1 }
  0x35   : > { %s1628_s11 = scalar_lea.hbm %s2066_s0, %s955_s2  ;;  %s1206_s29 = scalar_lea.hbm %s2066_s0, 1024 }
  0x36   : > { %s1201_s27 = scalar_lea.hbm %s1628_s11, 256  ;;  %p1207_p5 = scmp.lt.u32.totalorder %s1628_s11, %s2066_s0 }
  0x37   : > { %p1202_p4 = scmp.ne.s32.totalorder %s1628_s11, %s1201_s27  ;;  %p1208_p0 = scmp.lt.u32.totalorder %s1206_s29, %s1201_s27 }
  0x38   : > { %p1210_p7 = scmp.lt.u32.totalorder %s1201_s27, %s1628_s11 }
  0x39   : > { %p1204_p6 = pnand %p1203_p10, %p1202_p4  ;;  %p1209_p3 = por %p1208_p0, %p1207_p5 }
  0x3b   : > { %p1205_p9 = pneg %p1204_p6  ;;  %p1211_p2 = por %p1210_p7, %p1209_p3 }
  0x3d   : > { %p1212_p13 = pnand %p1211_p2, %p1205_p9 }
  0x3f   : > { %1215 = shalt.err (!%p1212_p13)
}
  0x40   : > { %s1216_s30 = scalar_lea.vmem %s1623_s4, 256  ;;  %s1449_s7 = smov [#allocation4]  }
  0x41   : > { %p1217_p6 = scmp.ne.s32.totalorder %s1623_s4, %s1216_s30  ;;  %s1221_s6 = sshll.u32 %s1449_s7, 4  ;;  %s1222_s6 = int_to_ptr.vmem [resolvable:$false] %s1221_s6 }
  0x42   : > { %s1223_s2 = scalar_lea.vmem %s1222_s6, 512  ;;  %p1224_p8 = scmp.lt.s32.totalorder %s1623_s4, %s1222_s6 }
  0x43   : > { %p1219_p4 = pnand %p1217_p6, %p1203_p10  ;;  %p1225_p0 = scmp.lt.s32.totalorder %s1223_s2, %s1216_s30 }
  0x45   : > { %p1220_p12 = pneg %p1219_p4  ;;  %p1226_p5 = por %p1225_p0, %p1224_p8 }
  0x47   : > { %p1227_p3 = pnand %p1226_p5, %p1220_p12 }
  0x49   : > { %1230 = shalt.err (!%p1227_p3)
}
  0x4a   : > { %s2038_s27 = smov 64   ;;  %s2039_s28 = smov 4  }
  0x4b   : > { %1053 = dma.hbm_to_vmem [thread:$0]  (!%p1634_p1), %s1628_s11, 256, %s1623_s4, %s1639_s23, %s2038_s27, %s2038_s27, %s2039_s28  }
  0x4c   : > { %p253_p7 = scmp.lt.s32.totalorder %s1447_s25, 5  ;;  %p2068_p8 = scmp.ge.s32.totalorder %s1447_s25, 1 }
  0x4d   : > { %s82_s13 = sadd.s32 1, %s1415_s17  ;;  %p89_p12 = scmp.ne.s32.totalorder %s1415_s17, %s1411_s16 }
  0x4e   : > { %p1673_p9 = pnand %p2068_p8, %p253_p7  ;;  %p2070_p13 = scmp.eq.s32.totalorder %s1568_s12, 0 }
  0x4f   : > { %p2072_p2 = scmp.eq.s32.totalorder %s1447_s25, 0  ;;  %p95_p6 = scmp.ne.s32.totalorder %s1411_s16, %s1407_s15 }
  0x50   : > { %s1683_s9 = scalar_select %p2070_p13, %s1415_s17, %s82_s13  }
  0x51   : > { %p91_p10 = por %p89_p12, %p2072_p2  ;;  %p2073_p4 = scmp.eq.s32.totalorder %s1545_s26, 3 }
  0x52   : > { %2071 = sst [smem:[#allocation27_spill]] %s1683_s9  ;;  %s234_s4 = sand.u32 1, %s1415_s17  }
  0x53   : > { %p1691_p0 = por %p2073_p4, %p89_p12  ;;  %p2075_p1 = scmp.eq.s32.totalorder %s1545_s26, 0 }
  0x54   : > { %p1704_p3 = por %p1595_p11, %p95_p6  ;;  %s956_s12 = sshll.u32 %s234_s4, 4 }
  0x55   : > { %s2074_s10 = scalar_select %p1691_p0, 1, 0 }
  0x56   : > { %p1698_p5 = por %p95_p6, %p2075_p1  ;;  %s995_s30 = sshll.u32 %s1443_s24, 8 }
  0x57   : > { %s2077_s23 = scalar_select %p1704_p3, 1, 0 }
  0x58   : > { %s2076_s11 = scalar_select %p1698_p5, 1, 0 }
  0x59   : > { %s2078_s1 = sld [smem:[#allocation29_spill]]  ;;  %s238_s2 = scalar_lea.vmem [#allocation7], %s956_s12 }
  0x5a   : > { %s245_s13 = sshll.u32 %s238_s2, 4  ;;  %p2079_p7 = scmp.lt.s32.totalorder %s1447_s25, 4  ;;  %s1714_s13 = int_to_ptr.vmem [resolvable:$true] %s245_s13 }
  0x5b   : > { %s1722_s27 = scalar_lea.sflag [#allocation8], %s234_s4 }
  0x5c   : > { %p1718_p11 = pnand %p2079_p7, %p91_p10 }
  0x5e   : > { %p1233_p12 = pneg %p1718_p11 }
  0x5f   : > { %s1712_s6 = scalar_lea.hbm %s2078_s1, %s995_s30  ;;  %s1236_s15 = scalar_lea.hbm %s2078_s1, 512 }
  0x60   : > { %s1231_s7 = scalar_lea.hbm %s1712_s6, 256  ;;  %p1237_p10 = scmp.lt.u32.totalorder %s1712_s6, %s2078_s1 }
  0x61   : > { %p1232_p8 = scmp.ne.s32.totalorder %s1712_s6, %s1231_s7  ;;  %p1238_p6 = scmp.lt.u32.totalorder %s1236_s15, %s1231_s7 }
  0x62   : > { %p1240_p1 = scmp.lt.u32.totalorder %s1231_s7, %s1712_s6 }
  0x63   : > { %p1234_p13 = pnand %p1233_p12, %p1232_p8  ;;  %p1239_p4 = por %p1238_p6, %p1237_p10 }
  0x65   : > { %p1235_p2 = pneg %p1234_p13  ;;  %p1241_p7 = por %p1240_p1, %p1239_p4 }
  0x67   : > { %p1242_p3 = pnand %p1241_p7, %p1235_p2 }
  0x69   : > { %1245 = shalt.err (!%p1242_p3)
}
  0x6a   : > { %s1246_s4 = scalar_lea.vmem %s1714_s13, 256  ;;  %s1452_s12 = smov [#allocation7]  }
  0x6b   : > { %p1247_p8 = scmp.ne.s32.totalorder %s1714_s13, %s1246_s4  ;;  %s1251_s30 = sshll.u32 %s1452_s12, 4  ;;  %s1252_s30 = int_to_ptr.vmem [resolvable:$false] %s1251_s30 }
  0x6c   : > { %s1253_s28 = scalar_lea.vmem %s1252_s30, 512  ;;  %p1254_p5 = scmp.lt.s32.totalorder %s1714_s13, %s1252_s30 }
  0x6d   : > { %p1249_p13 = pnand %p1247_p8, %p1233_p12  ;;  %p1255_p10 = scmp.lt.s32.totalorder %s1253_s28, %s1246_s4 }
  0x6f   : > { %p1250_p0 = pneg %p1249_p13  ;;  %p1256_p6 = por %p1255_p10, %p1254_p5 }
  0x71   : > { %p1257_p4 = pnand %p1256_p6, %p1250_p0 }
  0x73   : > { %1260 = shalt.err (!%p1257_p4)
}
  0x74   : > { %s2081_s7 = smov 4   ;;  %s2082_s15 = smov 64  }
  0x75   : > { %1056 = dma.hbm_to_vmem [thread:$0]  (!%p1718_p11), %s1712_s6, 256, %s1714_s13, %s1722_s27, %s2082_s15, %s2082_s15, %s2081_s7  }
  0x76   : > { %257 = sbr.rel (%p1673_p9) target bundleno = 3035 (0xbdb), region = 28  ;;  %s1756_s2 = sand.u32 (!%p1673_p9), 1, %s1423_s19  }
  0x77   : > { %s960_s4 = sshll.u32 (!%p1673_p9), %s1756_s2, 4  ;;  %s260_s12 = scalar_lea.sflag (!%p1673_p9), [#allocation5], %s1756_s2 }
  0x78   : > { %s1760_s30 = scalar_lea.vmem (!%p1673_p9), [#allocation4], %s960_s4  ;;  %p2083_p0 = scmp.ne.s32.totalorder (!%p1673_p9), %s2060_s5, 0 }
  0x7d   : > { %1390 = dma.done.wait (%p2083_p0), %s260_s12, 256  }
  0x7e   : > { %1392 = vsyncadd (%p2083_p0), %s260_s12, 4294967040  ;;  %s268_s27 = sand.u32 1, %s1411_s16   ;;  %p2084_p9 = scmp.ne.s32.totalorder %s2076_s11, 0 }
  0x7f   : > { %s961_s29 = sshll.u32 %s268_s27, 4  ;;  %s269_s6 = scalar_lea.sflag [#allocation8], %s268_s27 }
  0x80   : > { %s272_s13 = scalar_lea.vmem [#allocation7], %s961_s29 }
  0x81   : > { %1394 = dma.done.wait (%p2084_p9), %s269_s6, 256  }
  0x82   : > { %1396 = vsyncadd (%p2084_p9), %s269_s6, 4294967040  ;;  %s962_s8 = sshll.u32 %s1756_s2, 5  ;;  %s963_s28 = sshll.u32 %s268_s27, 3 }
  0x83   : > { %p323_p5 = scmp.eq.s32.totalorder %s1435_s22, 1  ;;  %s1773_s7 = scalar_lea.vmem [#allocation9], %s962_s8 }
  0x84   : > { %s1775_s5 = scalar_lea.vmem [#allocation10], %s963_s28  ;;  %s1777_s15 = scalar_lea.vmem [#allocation12], %s963_s28 }
  0x85   : > { %p965_p3 = scmp.ne.s32.totalorder %s1431_s21, 0 }
  0x86   : > { %vm328_vm0 = vcmask (!%p965_p3), 261120   ;;  %v1453_v0 = vmov (!%p965_p3), 0.0  }
  0x87   : > { %327 = sbr.rel (%p965_p3) target bundleno = 142 (0x8e), region = 40  ;;  %329 = vst.msk [vmem:[#allocation2] sm:$0xff] (!%p965_p3), %vm328_vm0, %v1453_v0  ;;  %330 = vst.msk [vmem:[#allocation3] sm:$0xff] (!%p965_p3), %vm328_vm0, %v1453_v0 }
  0x8e PF: > { %v1780_v1 = vld [vmem:[%s272_s13] sm:$0xff]   ;;  %v1454_v2 = vmov 0.0   ;;  %v1168_v3 = vld [vmem:[%s272_s13 + $0x8] sm:$0xff]   ;;  %vm1455_vm1 = vmmov 0   ;;  %vm355_vm2 = vcmask 261120   ;;  %s1456_s27 = smov 64  }
  0x8f   : > { %1008 = vmatprep.subr.bf16.mxu0 %v1454_v2  ;;  %1016 = vmatprep.subr.bf16.mxu1 %v1454_v2  ;;  %v335_v4 = vld [vmem:[#allocation2] sm:$0xff]  ;;  %s1801_s11 = scalar_select %p323_p5, 3, 0  ;;  %v336_v14 = vld [vmem:[#allocation3] sm:$0xff] }
  0x90   : > { %1009 = vmatpush3.bf16.msra.mxu0 %v1780_v1  ;;  %1012 = vmatprep.mubr.msk.bf16.mxu0 %vm1455_vm1, %v1454_v2  ;;  %v342_v5 = vpack.c.bf16 %v335_v4, %v335_v4  ;;  %s1457_s29 = smov 32   ;;  %s700_s24 = sand.u32 1, %s1545_s26  }
  0x91   : > { %1010 = vmatprep.subr.bf16.mxu0 %v1454_v2  ;;  %1017 = vmatpush3.bf16.msra.mxu1 %v1780_v1  ;;  %s966_s4 = sshll.u32 %s1801_s11, 2  ;;  %s991_s20 = sshll.u32 %s1435_s22, 7 }
  0x92   : > { %1018 = vmatprep.subr.bf16.mxu1 %v1454_v2  ;;  %1020 = vmatprep.mubr.msk.bf16.mxu1 %vm1455_vm1, %v1454_v2  ;;  %s339_s12 = scalar_lea.vmem %s1760_s30, %s966_s4 [#allocation4]  ;;  %s2085_s26 = sld [smem:[#allocation30_spill]] }
  0x93   : > { %v340_v6 = vld [vmem:[%s339_s12] sm:$0xf]  ;;  %s1821_s6 = scalar_select %p323_p5, 2, 1 }
  0x94   : > { %1011 = vmatpush3.bf16.msra.mxu0 %v1168_v3  ;;  %v341_v7 = vunpack.c.l.bf16 %v340_v6  ;;  %s1836_s28 = scalar_select %p323_p5, 1, 2 }
  0x95   : > { %1019 = vmatpush3.bf16.msra.mxu1 %v1168_v3  ;;  %1024 = vmatprep.subr.bf16.mxu0 %v1454_v2  ;;  %s972_s13 = sshll.u32 %s1821_s6, 2  ;;  %s2086_s17 = sld [smem:[#allocation31_spill]] }
  0x96   : > { %1032 = vmatprep.subr.bf16.mxu1 %v1454_v2  ;;  %s437_s8 = scalar_lea.vmem %s1760_s30, %s972_s13 [#allocation4]  ;;  %s976_s4 = sshll.u32 %s1836_s28, 2 }
  0x97   : > { %1013 = vmatmul.mubr.msk.bf16.vlgmr.msra.gmra.mrb[0].mxu0 %vm355_vm2, %v342_v5  ;;  %v438_v30 = vld [vmem:[%s437_s8] sm:$0xf]  ;;  %s521_s12 = scalar_lea.vmem %s1760_s30, %s976_s4 [#allocation4]  ;;  %p2088_p12 = scmp.ne.s32.totalorder %s2074_s10, 0 }
  0x98   : > { %1025 = vmatpush3.bf16.msra.mxu0 %v1780_v1  ;;  %1028 = vmatprep.mubr.msk.bf16.mxu0 %vm1455_vm1, %v1454_v2  ;;  %v439_v31 = vunpack.c.l.bf16 %v438_v30  ;;  %v522_v52 = vld [vmem:[%s521_s12] sm:$0xf]  ;;  %s1847_s13 = scalar_select %p323_p5, 0, 3 }
  0x99   : > { %1026 = vmatprep.subr.bf16.mxu0 %v1454_v2  ;;  %v523_v53 = vunpack.c.l.bf16 %v522_v52 }
  0x9a   : > { %s980_s8 = sshll.u32 %s1847_s13, 2  ;;  %s983_s1 = sshll.u32 %s1847_s13, 3 }
  0x9b   : > { %s605_s4 = scalar_lea.vmem %s1760_s30, %s980_s8 [#allocation4]  ;;  %s971_s30 = sshll.u32 %s1801_s11, 3 }
  0x9c   : > { %1027 = vmatpush3.bf16.msra.mxu0 %v1168_v3  ;;  %s433_s12 = scalar_lea.vmem %s1773_s7, %s971_s30 [#allocation9]  ;;  %s975_s8 = sshll.u32 %s1821_s6, 3 }
  0x9d   : > { %s517_s11 = scalar_lea.vmem %s1773_s7, %s975_s8 [#allocation9]  ;;  %s1458_s30 = smov 96  }
  0x9e   : > { %s987_s6 = sshll.u32 %s1431_s21, 1  ;;  %s685_s19 = scalar_lea.vmem %s1773_s7, %s983_s1 [#allocation9] }
 0x16a   : > { %v393_v8 = vpop.f32.mrb[0].mxu0 }
 0x16b   : > { %v399_v9 = vadd.f32 %v393_v8, %v341_v7  ;;  %v1014_v10 = vpop.f32.mrb[1].mxu0 }
 0x16c   : > { %v396_v11 = vpop.f32.mrb[2].mxu0  ;;  %v606_v10 = vld [vmem:[%s605_s4] sm:$0xf]  ;;  %s979_s4 = sshll.u32 %s1836_s28, 3 }
 0x16d   : > { %1169 = vtanh.f32 %v399_v9  ;;  %v1015_v12 = vpop.f32.mrb[3].mxu0  ;;  %v970_v15 = vmul.f32 -1.442695, %v399_v9  ;;  %v607_v11 = vunpack.c.l.bf16 %v606_v10 }
 0x16f   : > { %1171 = vpow2.f32 %v970_v15 }
 0x177   : > { %v1170_v13 = vpop.eup %1169 }
 0x178   : > { %413 = vrot.lane.b32.xlu0 %v1170_v13, %s1456_s27 }
 0x179   : > { %v1172_v16 = vpop.eup %1171 }
 0x17a   : > { %v403_v17 = vadd.f32 1.0, %v1172_v16 }
 0x17c   : > { %408 = vrot.lane.b32.xlu0 %v336_v14, %s1457_s29  ;;  %1173 = vrcp.f32 %v403_v17 }
 0x186   : > { %v1174_v18 = vpop.eup %1173 }
 0x1ea   : > { %v414_v19 = vpop.permute.xlu0 %413 }
 0x1eb   : > { %v416_v20 = vmul.f32 %v1174_v18, %v414_v19 }
 0x1ed   : > { %418 = vrot.lane.b32.xlu1 %v416_v20, %s1457_s29 }
 0x1ee   : > { %v409_v21 = vpop.permute.xlu0 %408 }
 0x1ef   : > { %v411_v22 = vmul.f32 %v1174_v18, %v409_v21 }
 0x25f   : > { %v419_v23 = vpop.permute.xlu1 %418 }
 0x260   : > { %v421_v24 = vadd.f32 %v419_v23, %v411_v22 }
 0x262   : > { %1175 = vtanh.f32 %v421_v24 }
 0x26c   : > { %v1176_v25 = vpop.eup %1175 }
 0x26d   : > { %424 = vrot.lane.b32.xlu1 %v1176_v25, %s1456_s27 }
 0x2df   : > { %v425_v26 = vpop.permute.xlu1 %424 }
 0x2e0   : > { %v1809_v27 = vmul.f32 %v1174_v18, %v425_v26 }
 0x2e2   : > { %v440_v28 = vpack.c.bf16 %v1809_v27, %v1809_v27 }
 0x2e4   : > { %442 = vrot.lane.b32.xlu0 %v440_v28, %s1457_s29 }
 0x356   : > { %v443_v29 = vpop.permute.xlu0 %442 }
 0x357   : > { %1021 = vmatmul.mubr.msk.bf16.vlgmr.msra.gmra.mrb[0].mxu1 %vm355_vm2, %v443_v29 }
 0x358   : > { %1033 = vmatpush3.bf16.msra.mxu1 %v1780_v1  ;;  %1036 = vmatprep.mubr.msk.bf16.mxu1 %vm1455_vm1, %v1454_v2 }
 0x359   : > { %1034 = vmatprep.subr.bf16.mxu1 %v1454_v2 }
 0x35c   : > { %1035 = vmatpush3.bf16.msra.mxu1 %v1168_v3 }
 0x42a   : > { %v481_v32 = vpop.f32.mrb[0].mxu1 }
 0x42b   : > { %v487_v33 = vadd.f32 %v481_v32, %v439_v31  ;;  %v1022_v34 = vpop.f32.mrb[1].mxu1 }
 0x42c   : > { %v484_v35 = vpop.f32.mrb[2].mxu1 }
 0x42d   : > { %1177 = vtanh.f32 %v487_v33  ;;  %v1023_v36 = vpop.f32.mrb[3].mxu1  ;;  %v974_v38 = vmul.f32 -1.442695, %v487_v33 }
 0x42f   : > { %1179 = vpow2.f32 %v974_v38 }
 0x437   : > { %v1178_v37 = vpop.eup %1177 }
 0x438   : > { %497 = vrot.lane.b32.xlu1 %v1178_v37, %s1456_s27 }
 0x439   : > { %v1180_v39 = vpop.eup %1179 }
 0x43a   : > { %v491_v40 = vadd.f32 1.0, %v1180_v39 }
 0x43c   : > { %1181 = vrcp.f32 %v491_v40 }
 0x446   : > { %v1182_v41 = vpop.eup %1181 }
 0x447   : > { %v495_v44 = vmul.f32 %v1182_v41, %v421_v24 }
 0x4aa   : > { %v498_v42 = vpop.permute.xlu1 %497 }
 0x4ab   : > { %v500_v43 = vmul.f32 %v1182_v41, %v498_v42 }
 0x4ad   : > { %502 = vrot.lane.b32.xlu0 %v500_v43, %s1457_s29 }
 0x51f   : > { %v503_v45 = vpop.permute.xlu0 %502 }
 0x520   : > { %v505_v46 = vadd.f32 %v503_v45, %v495_v44 }
 0x522   : > { %1183 = vtanh.f32 %v505_v46 }
 0x52c   : > { %v1184_v47 = vpop.eup %1183 }
 0x52d   : > { %508 = vrot.lane.b32.xlu1 %v1184_v47, %s1456_s27 }
 0x59f   : > { %v509_v48 = vpop.permute.xlu1 %508 }
 0x5a0   : > { %v1828_v49 = vmul.f32 %v1182_v41, %v509_v48 }
 0x5a2   : > { %v524_v50 = vpack.c.bf16 %v1828_v49, %v1828_v49 }
 0x5a4   : > { %526 = vrot.lane.b32.xlu0 %v524_v50, %s1457_s29 }
 0x616   : > { %v527_v51 = vpop.permute.xlu0 %526 }
 0x617   : > { %1029 = vmatmul.mubr.msk.bf16.vlgmr.msra.gmra.mrb[4].mxu0 %vm355_vm2, %v527_v51 }
 0x6ea   : > { %v565_v54 = vpop.f32.mrb[4].mxu0 }
 0x6eb   : > { %v571_v55 = vadd.f32 %v565_v54, %v523_v53  ;;  %v1030_v56 = vpop.f32.mrb[5].mxu0 }
 0x6ec   : > { %v568_v57 = vpop.f32.mrb[6].mxu0 }
 0x6ed   : > { %1185 = vtanh.f32 %v571_v55  ;;  %v1031_v58 = vpop.f32.mrb[7].mxu0  ;;  %v978_v60 = vmul.f32 -1.442695, %v571_v55 }
 0x6ef   : > { %1187 = vpow2.f32 %v978_v60 }
 0x6f7   : > { %v1186_v59 = vpop.eup %1185 }
 0x6f8   : > { %581 = vrot.lane.b32.xlu1 %v1186_v59, %s1456_s27 }
 0x6f9   : > { %v1188_v61 = vpop.eup %1187 }
 0x6fa   : > { %v575_v62 = vadd.f32 1.0, %v1188_v61 }
 0x6fc   : > { %1189 = vrcp.f32 %v575_v62 }
 0x706   : > { %v1190_v63 = vpop.eup %1189 }
 0x707   : > { %v579_v2 = vmul.f32 %v1190_v63, %v505_v46 }
 0x76a   : > { %v582_v0 = vpop.permute.xlu1 %581 }
 0x76b   : > { %v584_v1 = vmul.f32 %v1190_v63, %v582_v0 }
 0x76d   : > { %586 = vrot.lane.b32.xlu0 %v584_v1, %s1457_s29 }
 0x7df   : > { %v587_v3 = vpop.permute.xlu0 %586 }
 0x7e0   : > { %v589_v4 = vadd.f32 %v587_v3, %v579_v2 }
 0x7e2   : > { %1191 = vtanh.f32 %v589_v4 }
 0x7ec   : > { %v1192_v5 = vpop.eup %1191 }
 0x7ed   : > { %592 = vrot.lane.b32.xlu1 %v1192_v5, %s1456_s27 }
 0x85f   : > { %v593_v6 = vpop.permute.xlu1 %592 }
 0x860   : > { %v595_v7 = vmul.f32 %v1190_v63, %v593_v6 }
 0x862   : > { %v608_v8 = vpack.c.bf16 %v595_v7, %v595_v7 }
 0x864   : > { %610 = vrot.lane.b32.xlu0 %v608_v8, %s1457_s29 }
 0x8d6   : > { %v611_v9 = vpop.permute.xlu0 %610 }
 0x8d7   : > { %1037 = vmatmul.mubr.msk.bf16.vlgmr.msra.gmra.mrb[4].mxu1 %vm355_vm2, %v611_v9 }
 0x9aa   : > { %v649_v12 = vpop.f32.mrb[4].mxu1 }
 0x9ab   : > { %v655_v13 = vadd.f32 %v649_v12, %v607_v11  ;;  %v1038_v14 = vpop.f32.mrb[5].mxu1 }
 0x9ac   : > { %v652_v15 = vpop.f32.mrb[6].mxu1 }
 0x9ad   : > { %1193 = vtanh.f32 %v655_v13  ;;  %v1039_v16 = vpop.f32.mrb[7].mxu1  ;;  %v982_v18 = vmul.f32 -1.442695, %v655_v13 }
 0x9af   : > { %1195 = vpow2.f32 %v982_v18 }
 0x9b7   : > { %v1194_v17 = vpop.eup %1193 }
 0x9b8   : > { %665 = vrot.lane.b32.xlu1 %v1194_v17, %s1456_s27 }
 0x9b9   : > { %v1196_v19 = vpop.eup %1195 }
 0x9ba   : > { %v659_v20 = vadd.f32 1.0, %v1196_v19 }
 0x9bc   : > { %1197 = vrcp.f32 %v659_v20 }
 0x9c6   : > { %v1198_v21 = vpop.eup %1197 }
 0x9c7   : > { %v663_v24 = vmul.f32 %v1198_v21, %v589_v4 }
 0xa2a   : > { %v666_v22 = vpop.permute.xlu1 %665 }
 0xa2b   : > { %v668_v23 = vmul.f32 %v1198_v21, %v666_v22 }
 0xa2d   : > { %670 = vrot.lane.b32.xlu0 %v668_v23, %s1457_s29 }
 0xa31   : > { %429 = vrot.lane.b32.xlu0 %v1809_v27, %s1457_s29 }
 0xa9f   : > { %v671_v25 = vpop.permute.xlu0 %670 }
 0xaa0   : > { %v673_v26 = vadd.f32 %v671_v25, %v663_v24 }
 0xaa2   : > { %1199 = vtanh.f32 %v673_v26 }
 0xaa3   : > { %v430_v28 = vpop.permute.xlu0 %429 }
 0xaa4   : > { %434 = vst.msk [vmem:[%s433_s12] sm:$0xff] %vm355_vm2, %v430_v28  ;;  %s714_s12 = ssub.s32 1, %s987_s6 }
 0xaa5   : > { %s715_s28 = smul.u32 %s1435_s22, %s714_s12  ;;  %s1905_s12 = scalar_lea.sflag [#allocation11], %s700_s24 }
 0xaa7   : > { %s716_s8 = sadd.s32 %s1431_s21, %s715_s28  ;;  %s754_s21 = sshll.u32 %s1777_s15, 4  ;;  %s1903_s21 = int_to_ptr.vmem [resolvable:$true] %s754_s21 }
 0xaa8   : > { %s988_s0 = sshll.u32 %s716_s8, 2  ;;  %s1459_s28 = smov [#allocation10]  }
 0xaac   : > { %v1200_v29 = vpop.eup %1199 }
 0xaad   : > { %676 = vrot.lane.b32.xlu1 %v1200_v29, %s1456_s27  ;;  %s601_s27 = scalar_lea.vmem %s1773_s7, %s979_s4 [#allocation9]  ;;  %s741_s4 = sshll.u32 %s1775_s5, 4  ;;  %s1884_s4 = int_to_ptr.vmem [resolvable:$true] %s741_s4 }
 0xab1   : > { %513 = vrot.lane.b32.xlu1 %v1828_v49, %s1457_s29 }
 0xab5   : > { %597 = vrot.lane.b32.xlu1 %v595_v7, %s1457_s29 }
 0xb1f   : > { %v677_v27 = vpop.permute.xlu1 %676 }
 0xb20   : > { %v679_v30 = vmul.f32 %v1198_v21, %v677_v27 }
 0xb22   : > { %681 = vrot.lane.b32.xlu0 %v679_v30, %s1457_s29  ;;  %s989_s29 = sshll.u32 %s1435_s22, 3  ;;  %s1901_s22 = scalar_lea.hbm %s2086_s17, %s991_s20 }
 0xb23   : > { %v514_v31 = vpop.permute.xlu1 %513 }
 0xb24   : > { %518 = vst.msk [vmem:[%s517_s11] sm:$0xff] %vm355_vm2, %v514_v31  ;;  %s722_s11 = sadd.s32 %s989_s29, %s988_s0 }
 0xb25   : > { %s990_s9 = sshll.u32 %s722_s11, 7 }
 0xb26   : > { %689 = vrot.lane.b32.xlu0 %v673_v26, %s1458_s30  ;;  %s725_s30 = sshll.u32 %s1773_s7, 4  ;;  %s1890_s0 = scalar_lea.hbm %s2085_s26, %s990_s9  ;;  %s1892_s30 = int_to_ptr.vmem [resolvable:$true] %s725_s30 }
 0xb27   : > { %v598_v32 = vpop.permute.xlu1 %597  ;;  %s2087_s7 = smov %s2086_s17  ;;  %s1261_s9 = scalar_lea.vmem %s1884_s4, 128 }
 0xb28   : > { %602 = vst.msk [vmem:[%s601_s27] sm:$0xff] %vm355_vm2, %v598_v32  ;;  %s1882_s27 = scalar_lea.hbm %s2022_s3, %s991_s20  ;;  %p1262_p11 = scmp.ne.s32.totalorder %s1884_s4, %s1261_s9 }
 0xb2a   : > { %p1263_p2 = pnand %p1262_p11, %p2088_p12 }
 0xb2c   : > { %p1264_p1 = pneg %p1263_p2 }
 0xb94   : > { %v682_v33 = vpop.permute.xlu0 %681 }
 0xb95   : > { %686 = vst.msk [vmem:[%s685_s19] sm:$0xff] %vm355_vm2, %v682_v33  ;;  %687 = vst.msk [vmem:[#allocation2] sm:$0xff] %vm355_vm2, %v682_v33  ;;  %s1265_s19 = sshll.u32 %s1459_s28, 4  ;;  %s1266_s19 = int_to_ptr.vmem [resolvable:$false] %s1265_s19 }
 0xb96   : > { %693 = vst.msk [vmem:[%s1775_s5] sm:$0xff] %vm355_vm2, %v682_v33  ;;  %s1267_s8 = scalar_lea.vmem %s1266_s19, 256  ;;  %p1268_p7 = scmp.lt.s32.totalorder %s1884_s4, %s1266_s19 }
 0xb97   : > { %p1269_p8 = scmp.lt.s32.totalorder %s1267_s8, %s1261_s9 }
 0xb99   : > { %p1270_p13 = por %p1269_p8, %p1268_p7 }
 0xb9b   : > { %p1271_p10 = pnand %p1270_p13, %p1264_p1 }
 0xb9d   : > { %1274 = shalt.err (!%p1271_p10)
}
 0xb9e   : > { %s1275_s20 = scalar_lea.hbm %s1882_s27, 128  ;;  %s1279_s29 = scalar_lea.hbm %s2022_s3, 256 }
 0xb9f   : > { %p1276_p6 = scmp.ne.s32.totalorder %s1882_s27, %s1275_s20  ;;  %p1280_p9 = scmp.lt.u32.totalorder %s1882_s27, %s2022_s3 }
 0xba0   : > { %p1281_p5 = scmp.lt.u32.totalorder %s1279_s29, %s1275_s20  ;;  %p1283_p11 = scmp.lt.u32.totalorder %s1275_s20, %s1882_s27 }
 0xba1   : > { %p1277_p4 = pnand %p1276_p6, %p2088_p12 }
 0xba2   : > { %p1282_p3 = por %p1281_p5, %p1280_p9 }
 0xba3   : > { %p1278_p0 = pneg %p1277_p4 }
 0xba4   : > { %p1284_p2 = por %p1283_p11, %p1282_p3 }
 0xba6   : > { %p1285_p1 = pnand %p1284_p2, %p1278_p0 }
 0xba8   : > { %1288 = shalt.err (!%p1285_p1)
}
 0xba9   : > { %s2089_s6 = sld [smem:[#allocation25_spill]]  ;;  %s696_s1 = scalar_lea.sflag [#allocation6], %s1756_s2 }
 0xbaa   : > { %1045 = dma.vmem_to_hbm [thread:$0]  (%p2088_p12), %s1884_s4, 128, %s1882_s27, %s1905_s12  }
 0xbab   : > { %s1289_s16 = scalar_lea.vmem %s1892_s30, 512  ;;  %s1460_s17 = smov [#allocation9]  }
 0xbac   : > { %p1290_p7 = scmp.ne.s32.totalorder %s1892_s30, %s1289_s16  ;;  %s1293_s9 = sshll.u32 %s1460_s17, 4  ;;  %s1294_s9 = int_to_ptr.vmem [resolvable:$false] %s1293_s9 }
 0xbad   : > { %s1295_s28 = scalar_lea.vmem %s1294_s9, 1024  ;;  %p1296_p6 = scmp.lt.s32.totalorder %s1892_s30, %s1294_s9 }
 0xbae   : > { %p1297_p4 = scmp.lt.s32.totalorder %s1295_s28, %s1289_s16 }
 0xbaf   : > { %p2090_p8 = scmp.ne.s32.totalorder %s2089_s6, 0 }
 0xbb0   : > { %p1298_p0 = por %p1297_p4, %p1296_p6 }
 0xbb1   : > { %p1291_p13 = pnand %p1290_p7, %p2090_p8 }
 0xbb3   : > { %p1292_p10 = pneg %p1291_p13 }
 0xbb5   : > { %p1299_p9 = pnand %p1298_p0, %p1292_p10 }
 0xbb7   : > { %1302 = shalt.err (!%p1299_p9)
}
 0xbb8   : > { %s1303_s4 = scalar_lea.hbm %s1890_s0, 512  ;;  %s1307_s8 = scalar_lea.hbm %s2085_s26, 2048 }
 0xbb9   : > { %p1304_p5 = scmp.ne.s32.totalorder %s1890_s0, %s1303_s4  ;;  %p1308_p2 = scmp.lt.u32.totalorder %s1890_s0, %s2085_s26 }
 0xbba   : > { %p1309_p1 = scmp.lt.u32.totalorder %s1307_s8, %s1303_s4  ;;  %p1311_p13 = scmp.lt.u32.totalorder %s1303_s4, %s1890_s0 }
 0xbbb   : > { %p1305_p3 = pnand %p1304_p5, %p2090_p8 }
 0xbbc   : > { %p1310_p7 = por %p1309_p1, %p1308_p2 }
 0xbbd   : > { %p1306_p11 = pneg %p1305_p3 }
 0xbbe   : > { %p1312_p10 = por %p1311_p13, %p1310_p7 }
 0xbc0   : > { %p1313_p6 = pnand %p1312_p10, %p1306_p11 }
 0xbc2   : > { %1316 = shalt.err (!%p1313_p6)
}
 0xbc3   : > { %s1461_s5 = smov 128   ;;  %s1462_s29 = smov 8   ;;  %v690_v34 = vpop.permute.xlu0 %689 }
 0xbc4   : > { %1044 = dma.vmem_to_hbm [thread:$0]  (%p2090_p8), %s1892_s30, 512, %s1890_s0, %s696_s1, %s1461_s5, %s1461_s5, %s1462_s29   ;;  %692 = vst.msk [vmem:[#allocation3] sm:$0xff] %vm355_vm2, %v690_v34 }
 0xbc5   : > { %694 = vst.msk [vmem:[%s1777_s15] sm:$0xff] %vm355_vm2, %v690_v34  ;;  %s1317_s11 = scalar_lea.vmem %s1903_s21, 128  ;;  %s1463_s13 = smov [#allocation12]  }
 0xbc6   : > { %p1318_p4 = scmp.ne.s32.totalorder %s1903_s21, %s1317_s11  ;;  %s1321_s16 = sshll.u32 %s1463_s13, 4  ;;  %s1322_s16 = int_to_ptr.vmem [resolvable:$false] %s1321_s16 }
 0xbc7   : > { %s1323_s17 = scalar_lea.vmem %s1322_s16, 256  ;;  %p1324_p5 = scmp.lt.s32.totalorder %s1903_s21, %s1322_s16 }
 0xbc8   : > { %p1319_p0 = pnand %p1318_p4, %p2088_p12  ;;  %p1325_p3 = scmp.lt.s32.totalorder %s1323_s17, %s1317_s11 }
 0xbca   : > { %p1320_p9 = pneg %p1319_p0  ;;  %p1326_p11 = por %p1325_p3, %p1324_p5 }
 0xbcc   : > { %p1327_p2 = pnand %p1326_p11, %p1320_p9 }
 0xbce   : > { %1330 = shalt.err (!%p1327_p2)
}
 0xbcf   : > { %s1331_s2 = scalar_lea.hbm %s1901_s22, 128  ;;  %s1335_s0 = scalar_lea.hbm %s2087_s7, 256 }
 0xbd0   : > { %p1332_p8 = scmp.ne.s32.totalorder %s1901_s22, %s1331_s2  ;;  %p1336_p13 = scmp.lt.u32.totalorder %s1901_s22, %s2087_s7 }
 0xbd1   : > { %p1337_p10 = scmp.lt.u32.totalorder %s1335_s0, %s1331_s2  ;;  %p1339_p4 = scmp.lt.u32.totalorder %s1331_s2, %s1901_s22 }
 0xbd2   : > { %p1333_p1 = pnand %p1332_p8, %p2088_p12 }
 0xbd3   : > { %p1338_p6 = por %p1337_p10, %p1336_p13 }
 0xbd4   : > { %p1334_p7 = pneg %p1333_p1 }
 0xbd5   : > { %p1340_p0 = por %p1339_p4, %p1338_p6 }
 0xbd7   : > { %p1341_p9 = pnand %p1340_p0, %p1334_p7 }
 0xbd9   : > { %1344 = shalt.err (!%p1341_p9)
}
 0xbda   : > { %1046 = dma.vmem_to_hbm [thread:$0]  (%p2088_p12), %s1903_s21, 128, %s1901_s22, %s1905_s12  }
 0xbdb PF: > { %p1068_p5 = scmp.ge.s32.totalorder %s1447_s25, 2  ;;  %s766_s9 = sand.u32 1, %s1419_s18  }
 0xbdc   : > { %p2091_p3 = scmp.ne.s32.totalorder %s2065_s14, 0  ;;  %s767_s28 = scalar_lea.sflag [#allocation6], %s766_s9 }
 0xbde   : > { %p1058_p11 = pnand %p1068_p5, %p2091_p3 }
 0xbe0   : > { %1398 = dma.done.wait (!%p1058_p11), %s767_s28, 512  }
 0xbe1   : > { %1400 = vsyncadd (!%p1058_p11), %s767_s28, 4294966784  ;;  %s2092_s4 = sadd.s32 4294967294, %s1447_s25   ;;  %p2093_p2 = scmp.ne.s32.totalorder %s2077_s23, 0 }
 0xbe2   : > { %s775_s27 = sand.u32 1, %s2092_s4  }
 0xbe3   : > { %p1061_p8 = pnand %p1068_p5, %p2093_p2  ;;  %s776_s10 = scalar_lea.sflag [#allocation11], %s775_s27 }
 0xbe5   : > { %1402 = dma.done.wait (!%p1061_p8), %s776_s10, 256  }
 0xbe6   : > { %1404 = vsyncadd (!%p1061_p8), %s776_s10, 4294967040  ;;  %s27_s25 = sadd.s32 1, %s1447_s25   ;;  %s2094_s15 = sld [smem:[#allocation17_spill]] }
 0xbe7   : > { %p24_p12 = scmp.ge.s32.totalorder %s27_s25, 6   ;;  %s2095_s16 = sld [smem:[#allocation18_spill]] }
 0xbe8   : > { %s2096_s17 = sld [smem:[#allocation27_spill]]  ;;  %s2097_s18 = sld [smem:[#allocation19_spill]] }
 0xbe9   : > { %s2098_s19 = sld [smem:[#allocation20_spill]]  ;;  %s2099_s20 = sld [smem:[#allocation26_spill]] }
 0xbea   : > { %s2100_s21 = sld [smem:[#allocation21_spill]]  ;;  %s2101_s22 = sld [smem:[#allocation22_spill]] }
 0xbeb   : > { %s2102_s23 = sld [smem:[#allocation23_spill]]  ;;  %s2103_s24 = sld [smem:[#allocation24_spill]] }
 0xbec   :  { %26 = sbr.rel (!%p24_p12) target bundleno = 18 (0x12), region = 130 }
 0xbf3   :  { %790 = vsyncpa [#allocation5], 1 }
 0xbf4   :  { %792 = vsyncpa [#allocation5 + $0x1], 1 }
 0xbf5   :  { %793 = vsyncpa [#allocation8], 1 }
 0xbf6   :  { %795 = vsyncpa [#allocation8 + $0x1], 1 }
 0xbf7   :  { %796 = vsyncpa [#allocation6], 1 }
 0xbf8   :  { %798 = vsyncpa [#allocation6 + $0x1], 1 }
 0xbf9   :  { %799 = vsyncpa [#allocation11], 1 }
 0xbfa   :  { %801 = vsyncpa [#allocation11 + $0x1], 1 }

</bundles_post_ra>
